<compile_context>
chip_gen: v5e
topology: v5e:2x2
jax: 0.10.0
libtpu: 0.0.40
codegen_flags: <defaults>
</compile_context>

<pallas_src>
import jax
import jax.numpy as jnp
from jax.experimental import pallas as pl
from jax.experimental.pallas import tpu as pltpu


# ----------------------------------------------------------------------------
# Parameter fusion (host-side, done once)
# ----------------------------------------------------------------------------
def fuse_params(params, mxu_dtype=jnp.bfloat16):
    """params = (we, be, wih, whh, bih, bhh, wmu, bmu, wlv, blv), all in (in, out) layout.

    Returns (we, be, w_cat, b_cat, w_head, b_head):
      we     (In, H)        bf16     embed weight
      be     (1, H)         f32      embed bias
      w_cat  (L, 2H, 4H)    bf16     per-layer [W_ih ; W_hh] stacked along the contraction dim
      b_cat  (L, 1, 4H)     f32      b_ih + b_hh
      w_head (H, 2*O)       bf16     [W_mu | W_logvar]
      b_head (1, 2*O)       f32      [b_mu | b_logvar]
    PyTorch LSTMCell gate order (i, f, g, o) is preserved along the 4H axis.
    """
    (we, be, wih, whh, bih, bhh, wmu, bmu, wlv, blv) = params
    w_cat = jnp.concatenate([wih, whh], axis=1).astype(mxu_dtype)      # (L, 2H, 4H)
    b_cat = (bih + bhh).astype(jnp.float32)                            # (L, 1, 4H)
    w_head = jnp.concatenate([wmu, wlv], axis=1).astype(mxu_dtype)     # (H, 2*O)
    b_head = jnp.concatenate([bmu, blv], axis=1).astype(jnp.float32)   # (1, 2*O)
    return (we.astype(mxu_dtype), be.astype(jnp.float32), w_cat, b_cat, w_head, b_head)


# ----------------------------------------------------------------------------
# Gate math: one full-(B,4H)-vreg sigmoid pass + one tanh pass, then slice.
# ----------------------------------------------------------------------------
def _gate_math(gates, c_prev, H):
    sig = jax.nn.sigmoid(gates)          # (B, 4H) — single EUP pass over 128 lanes
    tnh = jnp.tanh(gates)                # (B, 4H)
    i_g = sig[:, 0 * H:1 * H]
    f_g = sig[:, 1 * H:2 * H]
    g_g = tnh[:, 2 * H:3 * H]
    o_g = sig[:, 3 * H:4 * H]
    c_new = f_g * c_prev + i_g * g_g
    h_new = o_g * jnp.tanh(c_new)
    return h_new, c_new


# ----------------------------------------------------------------------------
# Single-step kernel (matches the module's forward() exactly)
# State slab layout: (B, L*2H), columns [l*2H : l*2H+H] = h_l, [l*2H+H : (l+1)*2H] = c_l.
# ----------------------------------------------------------------------------
def _gaussian_lstm_step_kernel(x_ref, we_ref, be_ref, wcat_ref, bcat_ref,
                               whead_ref, bhead_ref, state_ref, eps_ref,
                               zml_ref, state_out_ref):
    H = we_ref.shape[1]
    O = whead_ref.shape[1] // 2
    L = wcat_ref.shape[0]
    mxu = we_ref.dtype

    # Load the whole (aliased) state slab into vregs BEFORE any write: correctness no longer
    # depends on per-layer read-before-write ordering of the aliased buffer.
    state = state_ref[...]                                              # (B, L*2H) f32

    # embed = Linear(input_size, hidden_size)
    h_in = jnp.dot(x_ref[...].astype(mxu), we_ref[...],
                   preferred_element_type=jnp.float32) + be_ref[...]

    for l in range(L):
        base = l * 2 * H
        h_prev = state[:, base:base + H]
        c_prev = state[:, base + H:base + 2 * H]
        # No concat: two matmuls on static slices of the stacked weight ref.
        gates = (jnp.dot(h_in.astype(mxu), wcat_ref[l, :H, :],
                         preferred_element_type=jnp.float32)
                 + jnp.dot(h_prev.astype(mxu), wcat_ref[l, H:, :],
                           preferred_element_type=jnp.float32)
                 + bcat_ref[l])
        h_new, c_new = _gate_math(gates, c_prev, H)
        state_out_ref[:, base:base + H] = h_new
        state_out_ref[:, base + H:base + 2 * H] = c_new
        h_in = h_new

    # fused mu|logvar head + reparameterization z = eps * exp(0.5*logvar) + mu
    heads = jnp.dot(h_in.astype(mxu), whead_ref[...],
                    preferred_element_type=jnp.float32) + bhead_ref[...]
    mu = heads[:, :O]
    lv = heads[:, O:]
    zml_ref[:, :O] = eps_ref[...] * jnp.exp(0.5 * lv) + mu
    zml_ref[:, O:] = heads                                              # already mu|logvar


def pack_state(h, c):
    """(L,B,H),(L,B,H) -> lane-dense (B, L*2H) slab with per-layer [h_l | c_l]."""
    L, B, H = h.shape
    return jnp.concatenate([h, c], axis=-1).transpose(1, 0, 2).reshape(B, L * 2 * H)


def unpack_state(state, n_layers, H):
    B = state.shape[0]
    s = state.reshape(B, n_layers, 2 * H).transpose(1, 0, 2)
    return s[:, :, :H], s[:, :, H:]


def gaussian_lstm_forward(x, fused_params, state, eps):
    """One GaussianLSTM step. Returns (z, mu, logvar, new_state_slab)."""
    we, be, wcat, bcat, whead, bhead = fused_params
    batch = x.shape[0]
    n_layers = wcat.shape[0]
    H = we.shape[1]
    O = whead.shape[1] // 2

    vmem = pl.BlockSpec(memory_space=pltpu.MemorySpace.VMEM)
    out_shape = (
        jax.ShapeDtypeStruct((batch, 3 * O), jnp.float32),              # z|mu|logvar
        jax.ShapeDtypeStruct((batch, n_layers * 2 * H), jnp.float32),   # state (aliases input)
    )
    zml, state_new = pl.pallas_call(
        _gaussian_lstm_step_kernel,
        out_shape=out_shape,
        in_specs=[vmem] * 9,
        out_specs=(vmem, vmem),
        input_output_aliases={7: 1},     # state slab updated in place (single HBM buffer)
    )(x, we, be, wcat, bcat, whead, bhead, state, eps)
    z, mu, logvar = zml[:, :O], zml[:, O:2 * O], zml[:, 2 * O:]
    return z, mu, logvar, state_new


# ----------------------------------------------------------------------------
# Sequence kernel: time-chunked grid, unrolled inner loop, weights VMEM-resident,
# h/c carried in VMEM scratch, non-recurrent matmuls hoisted per chunk.
# ----------------------------------------------------------------------------
def _gaussian_lstm_seq_kernel(x_ref, eps_ref, we_ref, be_ref, wcat_ref, bcat_ref,
                              whead_ref, bhead_ref, h0_ref, c0_ref,
                              zml_ref, h_out_ref, c_out_ref,
                              h_sc, c_sc):
    ci = pl.program_id(0)
    Tc, B, In = x_ref.shape
    H = we_ref.shape[1]
    O = whead_ref.shape[1] // 2
    L = wcat_ref.shape[0]
    mxu = we_ref.dtype

    @pl.when(ci == 0)
    def _():
        h_sc[...] = h0_ref[...]
        c_sc[...] = c0_ref[...]

    # ---- chunk prologue: hoisted, non-recurrent matmuls over Tc*B rows (better MXU fill) ----
    x_flat = x_ref[...].reshape(Tc * B, In).astype(mxu)
    emb = jnp.dot(x_flat, we_ref[...], preferred_element_type=jnp.float32) + be_ref[...]
    g0_pre = (jnp.dot(emb.astype(mxu), wcat_ref[0, :H, :],
                      preferred_element_type=jnp.float32) + bcat_ref[0])
    g0_pre = g0_pre.reshape(Tc, B, 4 * H)            # layer-0 input-gate contribution, all steps
    eps_all = eps_ref[...]                           # (Tc, B, O)

    # ---- recurrent loop over the chunk (fully unrolled: LLO sees a multi-step window) ----
    for t in range(Tc):
        # layer 0: only the hidden->gates matmul remains on the serial path
        gates = g0_pre[t] + jnp.dot(h_sc[0].astype(mxu), wcat_ref[0, H:, :],
                                    preferred_element_type=jnp.float32)
        h_new, c_new = _gate_math(gates, c_sc[0], H)
        h_sc[0] = h_new
        c_sc[0] = c_new
        h_in = h_new

        for l in range(1, L):
            gates = (jnp.dot(h_in.astype(mxu), wcat_ref[l, :H, :],
                             preferred_element_type=jnp.float32)
                     + jnp.dot(h_sc[l].astype(mxu), wcat_ref[l, H:, :],
                               preferred_element_type=jnp.float32)
                     + bcat_ref[l])
            h_new, c_new = _gate_math(gates, c_sc[l], H)
            h_sc[l] = h_new
            c_sc[l] = c_new
            h_in = h_new

        heads = jnp.dot(h_in.astype(mxu), whead_ref[...],
                        preferred_element_type=jnp.float32) + bhead_ref[...]
        mu = heads[:, :O]
        lv = heads[:, O:]
        zml_ref[t, :, :O] = eps_all[t] * jnp.exp(0.5 * lv) + mu
        zml_ref[t, :, O:] = heads

    @pl.when(ci == pl.num_programs(0) - 1)
    def _():
        h_out_ref[...] = h_sc[...]
        c_out_ref[...] = c_sc[...]


def gaussian_lstm_sequence(x_seq, fused_params, hidden, eps_seq, t_chunk=None):
    """Runs the cell over a whole sequence inside one kernel.

    x_seq: (T, B, input), eps_seq: (T, B, out).
    Returns (z_seq, mu_seq, logvar_seq, h_T, c_T).
    """
    we, be, wcat, bcat, whead, bhead = fused_params
    h0, c0 = hidden
    T, batch, _ = x_seq.shape
    n_layers = wcat.shape[0]
    H = we.shape[1]
    O = whead.shape[1] // 2

    if t_chunk is None:
        t_chunk = next(tc for tc in (8, 4, 2, 1) if T % tc == 0)
    n_chunks = T // t_chunk

    def resident(arr):   # whole array, VMEM-resident for the entire time grid
        return pl.BlockSpec(arr.shape, lambda ci, _nd=arr.ndim: (0,) * _nd)

    out_shape = (
        jax.ShapeDtypeStruct((T, batch, 3 * O), jnp.float32),
        jax.ShapeDtypeStruct((n_layers, batch, H), jnp.float32),
        jax.ShapeDtypeStruct((n_layers, batch, H), jnp.float32),
    )
    zml_seq, h_T, c_T = pl.pallas_call(
        _gaussian_lstm_seq_kernel,
        out_shape=out_shape,
        grid=(n_chunks,),
        in_specs=[
            pl.BlockSpec((t_chunk, batch, x_seq.shape[2]), lambda ci: (ci, 0, 0)),   # x chunk
            pl.BlockSpec((t_chunk, batch, O), lambda ci: (ci, 0, 0)),                # eps chunk
            resident(we), resident(be), resident(wcat), resident(bcat),
            resident(whead), resident(bhead), resident(h0), resident(c0),
        ],
        out_specs=(
            pl.BlockSpec((t_chunk, batch, 3 * O), lambda ci: (ci, 0, 0)),
            pl.BlockSpec((n_layers, batch, H), lambda ci: (0, 0, 0)),
            pl.BlockSpec((n_layers, batch, H), lambda ci: (0, 0, 0)),
        ),
        scratch_shapes=[pltpu.VMEM((n_layers, batch, H), jnp.float32),
                        pltpu.VMEM((n_layers, batch, H), jnp.float32)],
        compiler_params=pltpu.CompilerParams(dimension_semantics=("arbitrary",)),
    )(x_seq, eps_seq, we, be, wcat, bcat, whead, bhead, h0, c0)
    z = zml_seq[:, :, :O]
    mu = zml_seq[:, :, O:2 * O]
    logvar = zml_seq[:, :, 2 * O:]
    return z, mu, logvar, h_T, c_T


# ----------------------------------------------------------------------------
# Pure-JAX reference (float32, same fused-param math)
# ----------------------------------------------------------------------------
def _reference_step(x, fparams_f32, h, c, eps):
    we, be, wcat, bcat, whead, bhead = fparams_f32
    H = we.shape[1]
    O = whead.shape[1] // 2
    h_in = x @ we + be
    h_new, c_new = [], []
    for l in range(wcat.shape[0]):
        gates = jnp.concatenate([h_in, h[l]], axis=-1) @ wcat[l] + bcat[l]
        i_g = jax.nn.sigmoid(gates[:, 0 * H:1 * H])
        f_g = jax.nn.sigmoid(gates[:, 1 * H:2 * H])
        g_g = jnp.tanh(gates[:, 2 * H:3 * H])
        o_g = jax.nn.sigmoid(gates[:, 3 * H:4 * H])
        c_l = f_g * c[l] + i_g * g_g
        h_l = o_g * jnp.tanh(c_l)
        h_new.append(h_l)
        c_new.append(c_l)
        h_in = h_l
    heads = h_in @ whead + bhead
    mu, lv = heads[:, :O], heads[:, O:]
    z = eps * jnp.exp(0.5 * lv) + mu
    return z, mu, lv, jnp.stack(h_new), jnp.stack(c_new)


# ----------------------------------------------------------------------------
if __name__ == "__main__":
    batch, input_size, output_size, hidden_size, n_layers = 8, 16, 8, 32, 2
    T = 8
    ATOL = RTOL = 3e-2   # bf16 MXU operands vs. f32 reference

    key = jax.random.PRNGKey(0)
    keys = jax.random.split(key, 16)

    def U(k, shape, fan_in):
        bound = 1.0 / jnp.sqrt(jnp.float32(fan_in))
        return jax.random.uniform(k, shape, jnp.float32, -bound, bound)

    raw_params = (
        U(keys[0], (input_size, hidden_size), input_size),                   # embed W^T
        U(keys[1], (1, hidden_size), input_size),                            # embed b
        U(keys[2], (n_layers, hidden_size, 4 * hidden_size), hidden_size),   # W_ih^T stacked
        U(keys[3], (n_layers, hidden_size, 4 * hidden_size), hidden_size),   # W_hh^T stacked
        U(keys[4], (n_layers, 1, 4 * hidden_size), hidden_size),             # b_ih
        U(keys[5], (n_layers, 1, 4 * hidden_size), hidden_size),             # b_hh
        U(keys[6], (hidden_size, output_size), hidden_size),                 # mu_net W^T
        U(keys[7], (1, output_size), hidden_size),                           # mu_net b
        U(keys[8], (hidden_size, output_size), hidden_size),                 # logvar_net W^T
        U(keys[9], (1, output_size), hidden_size),                           # logvar_net b
    )
    fused = fuse_params(raw_params)                                   # bf16 MXU weights
    fused_f32 = tuple(p.astype(jnp.float32) for p in fused)           # reference math

    # init_hidden(): zeros for every layer
    h0 = jnp.zeros((n_layers, batch, hidden_size), jnp.float32)
    c0 = jnp.zeros((n_layers, batch, hidden_size), jnp.float32)

    # ---- single-step kernel, carried over two timesteps ------------------------------
    x0 = jax.random.normal(keys[10], (batch, input_size), jnp.float32)
    x1 = jax.random.normal(keys[11], (batch, input_size), jnp.float32)
    # eps plays the role of logvar.data.new(...).normal_() in reparameterize()
    eps0 = jax.random.normal(keys[12], (batch, output_size), jnp.float32)
    eps1 = jax.random.normal(keys[13], (batch, output_size), jnp.float32)

    state0 = pack_state(h0, c0)                       # lane-dense (B, L*2H) = (8, 128)
    step_fn = jax.jit(gaussian_lstm_forward)
    z0, mu0, lv0, state1 = step_fn(x0, fused, state0, eps0)
    z1, mu1, lv1, state2 = step_fn(x1, fused, state1, eps1)
    jax.block_until_ready((z1, mu1, lv1, state2))
    h1, c1 = unpack_state(state1, n_layers, hidden_size)
    h2, c2 = unpack_state(state2, n_layers, hidden_size)

    rz0, rmu0, rlv0, rh1, rc1 = _reference_step(x0, fused_f32, h0, c0, eps0)
    rz1, rmu1, rlv1, rh2, rc2 = _reference_step(x1, fused_f32, rh1, rc1, eps1)

    assert z0.shape == (batch, output_size) and h1.shape == (n_layers, batch, hidden_size)
    for a, b in [(z0, rz0), (mu0, rmu0), (lv0, rlv0), (h1, rh1), (c1, rc1),
                 (z1, rz1), (mu1, rmu1), (lv1, rlv1), (h2, rh2), (c2, rc2)]:
        assert jnp.allclose(a, b, atol=ATOL, rtol=RTOL)

    # ---- chunked in-kernel time loop over a whole sequence ---------------------------
    x_seq = jax.random.normal(keys[14], (T, batch, input_size), jnp.float32)
    eps_seq = jax.random.normal(keys[15], (T, batch, output_size), jnp.float32)

    seq_fn = jax.jit(lambda xs, fp, hc, es: gaussian_lstm_sequence(xs, fp, hc, es, t_chunk=4))
    z_s, mu_s, lv_s, h_T, c_T = seq_fn(x_seq, fused, (h0, c0), eps_seq)
    jax.block_until_ready((z_s, h_T, c_T))

    h, c = h0, c0
    for t in range(T):
        rz, rmu, rlv, h, c = _reference_step(x_seq[t], fused_f32, h, c, eps_seq[t])
        assert jnp.allclose(z_s[t], rz, atol=ATOL, rtol=RTOL)
        assert jnp.allclose(mu_s[t], rmu, atol=ATOL, rtol=RTOL)
        assert jnp.allclose(lv_s[t], rlv, atol=ATOL, rtol=RTOL)
    assert jnp.allclose(h_T, h, atol=ATOL, rtol=RTOL)
    assert jnp.allclose(c_T, c, atol=ATOL, rtol=RTOL)

    print("KERNEL_OK")
</pallas_src>

<mosaic_0001>
module attributes {stable_mosaic.version = 11 : i64} {
  func.func @_gaussian_lstm_step_kernel(%arg0: memref<8x16xf32, #tpu.memory_space<vmem>>, %arg1: memref<16x32xbf16, #tpu.memory_space<vmem>>, %arg2: memref<1x32xf32, #tpu.memory_space<vmem>>, %arg3: memref<2x64x128xbf16, #tpu.memory_space<vmem>>, %arg4: memref<2x1x128xf32, #tpu.memory_space<vmem>>, %arg5: memref<32x16xbf16, #tpu.memory_space<vmem>>, %arg6: memref<1x16xf32, #tpu.memory_space<vmem>>, %arg7: memref<8x128xf32, #tpu.memory_space<vmem>>, %arg8: memref<8x8xf32, #tpu.memory_space<vmem>>, %arg9: memref<8x24xf32, #tpu.memory_space<vmem>>, %arg10: memref<8x128xf32, #tpu.memory_space<vmem>>) attributes {dimension_semantics = [], scalar_prefetch = 0 : i64, scratch_operands = 0 : i64, tpu.core_type = #tpu.core_type<tc>} {
    %c0 = arith.constant 0 : index
    %c0_0 = arith.constant 0 : index
    %0 = vector.load %arg7[%c0, %c0_0] : memref<8x128xf32, #tpu.memory_space<vmem>>, vector<8x128xf32>
    %c0_1 = arith.constant 0 : index
    %c0_2 = arith.constant 0 : index
    %1 = vector.load %arg0[%c0_1, %c0_2] : memref<8x16xf32, #tpu.memory_space<vmem>>, vector<8x16xf32>
    %2 = arith.truncf %1 : vector<8x16xf32> to vector<8x16xbf16>
    %c0_3 = arith.constant 0 : index
    %c0_4 = arith.constant 0 : index
    %3 = vector.load %arg1[%c0_3, %c0_4] : memref<16x32xbf16, #tpu.memory_space<vmem>>, vector<16x32xbf16>
    %cst = arith.constant dense<0.000000e+00> : vector<8x32xf32>
    %4 = tpu.matmul %2, %3, %cst {dimension_numbers = #tpu.dot_dimension_numbers<[1], [0], [0], [1], [0, 0, 1, 1], [], []>} : vector<8x16xbf16>, vector<16x32xbf16>, vector<8x32xf32> -> vector<8x32xf32>
    %c0_5 = arith.constant 0 : index
    %c0_6 = arith.constant 0 : index
    %5 = vector.load %arg2[%c0_5, %c0_6] : memref<1x32xf32, #tpu.memory_space<vmem>>, vector<1x32xf32>
    %6 = vector.broadcast %5 : vector<1x32xf32> to vector<8x32xf32>
    %7 = arith.addf %4, %6 : vector<8x32xf32>
    %8 = vector.extract_strided_slice %0 {offsets = [0, 0], sizes = [8, 32], strides = [1, 1]} : vector<8x128xf32> to vector<8x32xf32>
    %9 = vector.extract_strided_slice %0 {offsets = [0, 32], sizes = [8, 32], strides = [1, 1]} : vector<8x128xf32> to vector<8x32xf32>
    %10 = arith.truncf %7 : vector<8x32xf32> to vector<8x32xbf16>
    %c0_7 = arith.constant 0 : index
    %c0_8 = arith.constant 0 : index
    %c0_9 = arith.constant 0 : index
    %11 = vector.load %arg3[%c0_7, %c0_8, %c0_9] : memref<2x64x128xbf16, #tpu.memory_space<vmem>>, vector<1x32x128xbf16>
    %12 = vector.shape_cast %11 : vector<1x32x128xbf16> to vector<32x128xbf16>
    %cst_10 = arith.constant dense<0.000000e+00> : vector<8x128xf32>
    %13 = tpu.matmul %10, %12, %cst_10 {dimension_numbers = #tpu.dot_dimension_numbers<[1], [0], [0], [1], [0, 0, 1, 1], [], []>} : vector<8x32xbf16>, vector<32x128xbf16>, vector<8x128xf32> -> vector<8x128xf32>
    %14 = arith.truncf %8 : vector<8x32xf32> to vector<8x32xbf16>
    %c0_11 = arith.constant 0 : index
    %c32 = arith.constant 32 : index
    %c0_12 = arith.constant 0 : index
    %15 = vector.load %arg3[%c0_11, %c32, %c0_12] : memref<2x64x128xbf16, #tpu.memory_space<vmem>>, vector<1x32x128xbf16>
    %16 = vector.shape_cast %15 : vector<1x32x128xbf16> to vector<32x128xbf16>
    %cst_13 = arith.constant dense<0.000000e+00> : vector<8x128xf32>
    %17 = tpu.matmul %14, %16, %cst_13 {dimension_numbers = #tpu.dot_dimension_numbers<[1], [0], [0], [1], [0, 0, 1, 1], [], []>} : vector<8x32xbf16>, vector<32x128xbf16>, vector<8x128xf32> -> vector<8x128xf32>
    %18 = arith.addf %13, %17 : vector<8x128xf32>
    %c0_14 = arith.constant 0 : index
    %c0_15 = arith.constant 0 : index
    %c0_16 = arith.constant 0 : index
    %19 = vector.load %arg4[%c0_14, %c0_15, %c0_16] : memref<2x1x128xf32, #tpu.memory_space<vmem>>, vector<1x1x128xf32>
    %20 = vector.shape_cast %19 : vector<1x1x128xf32> to vector<1x128xf32>
    %21 = vector.broadcast %20 : vector<1x128xf32> to vector<8x128xf32>
    %22 = arith.addf %18, %21 : vector<8x128xf32>
    %23 = arith.negf %22 : vector<8x128xf32>
    %24 = math.exp %23 : vector<8x128xf32>
    %cst_17 = arith.constant 1.000000e+00 : f32
    %25 = vector.broadcast %cst_17 : f32 to vector<8x128xf32>
    %26 = arith.addf %25, %24 : vector<8x128xf32>
    %27 = arith.divf %25, %26 : vector<8x128xf32>
    %28 = math.tanh %22 : vector<8x128xf32>
    %29 = vector.extract_strided_slice %27 {offsets = [0, 0], sizes = [8, 32], strides = [1, 1]} : vector<8x128xf32> to vector<8x32xf32>
    %30 = vector.extract_strided_slice %27 {offsets = [0, 32], sizes = [8, 32], strides = [1, 1]} : vector<8x128xf32> to vector<8x32xf32>
    %31 = vector.extract_strided_slice %28 {offsets = [0, 64], sizes = [8, 32], strides = [1, 1]} : vector<8x128xf32> to vector<8x32xf32>
    %32 = vector.extract_strided_slice %27 {offsets = [0, 96], sizes = [8, 32], strides = [1, 1]} : vector<8x128xf32> to vector<8x32xf32>
    %33 = arith.mulf %30, %9 : vector<8x32xf32>
    %34 = arith.mulf %29, %31 : vector<8x32xf32>
    %35 = arith.addf %33, %34 : vector<8x32xf32>
    %36 = math.tanh %35 : vector<8x32xf32>
    %37 = arith.mulf %32, %36 : vector<8x32xf32>
    %c0_18 = arith.constant 0 : index
    %c0_19 = arith.constant 0 : index
    %38 = vector.load %arg10[%c0_18, %c0_19] : memref<8x128xf32, #tpu.memory_space<vmem>>, vector<8x32xf32>
    tpu.vector_store %arg10[%c0_18, %c0_19], %37 {strides = array<i32>} : memref<8x128xf32, #tpu.memory_space<vmem>>, vector<8x32xf32>,
    %c0_20 = arith.constant 0 : index
    %c32_21 = arith.constant 32 : index
    %39 = vector.load %arg10[%c0_20, %c32_21] : memref<8x128xf32, #tpu.memory_space<vmem>>, vector<8x32xf32>
    tpu.vector_store %arg10[%c0_20, %c32_21], %35 {strides = array<i32>} : memref<8x128xf32, #tpu.memory_space<vmem>>, vector<8x32xf32>,
    %40 = vector.extract_strided_slice %0 {offsets = [0, 64], sizes = [8, 32], strides = [1, 1]} : vector<8x128xf32> to vector<8x32xf32>
    %41 = vector.extract_strided_slice %0 {offsets = [0, 96], sizes = [8, 32], strides = [1, 1]} : vector<8x128xf32> to vector<8x32xf32>
    %42 = arith.truncf %37 : vector<8x32xf32> to vector<8x32xbf16>
    %c1 = arith.constant 1 : index
    %c0_22 = arith.constant 0 : index
    %c0_23 = arith.constant 0 : index
    %43 = vector.load %arg3[%c1, %c0_22, %c0_23] : memref<2x64x128xbf16, #tpu.memory_space<vmem>>, vector<1x32x128xbf16>
    %44 = vector.shape_cast %43 : vector<1x32x128xbf16> to vector<32x128xbf16>
    %cst_24 = arith.constant dense<0.000000e+00> : vector<8x128xf32>
    %45 = tpu.matmul %42, %44, %cst_24 {dimension_numbers = #tpu.dot_dimension_numbers<[1], [0], [0], [1], [0, 0, 1, 1], [], []>} : vector<8x32xbf16>, vector<32x128xbf16>, vector<8x128xf32> -> vector<8x128xf32>
    %46 = arith.truncf %40 : vector<8x32xf32> to vector<8x32xbf16>
    %c1_25 = arith.constant 1 : index
    %c32_26 = arith.constant 32 : index
    %c0_27 = arith.constant 0 : index
    %47 = vector.load %arg3[%c1_25, %c32_26, %c0_27] : memref<2x64x128xbf16, #tpu.memory_space<vmem>>, vector<1x32x128xbf16>
    %48 = vector.shape_cast %47 : vector<1x32x128xbf16> to vector<32x128xbf16>
    %cst_28 = arith.constant dense<0.000000e+00> : vector<8x128xf32>
    %49 = tpu.matmul %46, %48, %cst_28 {dimension_numbers = #tpu.dot_dimension_numbers<[1], [0], [0], [1], [0, 0, 1, 1], [], []>} : vector<8x32xbf16>, vector<32x128xbf16>, vector<8x128xf32> -> vector<8x128xf32>
    %50 = arith.addf %45, %49 : vector<8x128xf32>
    %c1_29 = arith.constant 1 : index
    %c0_30 = arith.constant 0 : index
    %c0_31 = arith.constant 0 : index
    %51 = vector.load %arg4[%c1_29, %c0_30, %c0_31] : memref<2x1x128xf32, #tpu.memory_space<vmem>>, vector<1x1x128xf32>
    %52 = vector.shape_cast %51 : vector<1x1x128xf32> to vector<1x128xf32>
    %53 = vector.broadcast %52 : vector<1x128xf32> to vector<8x128xf32>
    %54 = arith.addf %50, %53 : vector<8x128xf32>
    %55 = arith.negf %54 : vector<8x128xf32>
    %56 = math.exp %55 : vector<8x128xf32>
    %cst_32 = arith.constant 1.000000e+00 : f32
    %57 = vector.broadcast %cst_32 : f32 to vector<8x128xf32>
    %58 = arith.addf %57, %56 : vector<8x128xf32>
    %59 = arith.divf %57, %58 : vector<8x128xf32>
    %60 = math.tanh %54 : vector<8x128xf32>
    %61 = vector.extract_strided_slice %59 {offsets = [0, 0], sizes = [8, 32], strides = [1, 1]} : vector<8x128xf32> to vector<8x32xf32>
    %62 = vector.extract_strided_slice %59 {offsets = [0, 32], sizes = [8, 32], strides = [1, 1]} : vector<8x128xf32> to vector<8x32xf32>
    %63 = vector.extract_strided_slice %60 {offsets = [0, 64], sizes = [8, 32], strides = [1, 1]} : vector<8x128xf32> to vector<8x32xf32>
    %64 = vector.extract_strided_slice %59 {offsets = [0, 96], sizes = [8, 32], strides = [1, 1]} : vector<8x128xf32> to vector<8x32xf32>
    %65 = arith.mulf %62, %41 : vector<8x32xf32>
    %66 = arith.mulf %61, %63 : vector<8x32xf32>
    %67 = arith.addf %65, %66 : vector<8x32xf32>
    %68 = math.tanh %67 : vector<8x32xf32>
    %69 = arith.mulf %64, %68 : vector<8x32xf32>
    %c0_33 = arith.constant 0 : index
    %c64 = arith.constant 64 : index
    %70 = vector.load %arg10[%c0_33, %c64] : memref<8x128xf32, #tpu.memory_space<vmem>>, vector<8x32xf32>
    tpu.vector_store %arg10[%c0_33, %c64], %69 {strides = array<i32>} : memref<8x128xf32, #tpu.memory_space<vmem>>, vector<8x32xf32>,
    %c0_34 = arith.constant 0 : index
    %c96 = arith.constant 96 : index
    %71 = vector.load %arg10[%c0_34, %c96] : memref<8x128xf32, #tpu.memory_space<vmem>>, vector<8x32xf32>
    tpu.vector_store %arg10[%c0_34, %c96], %67 {strides = array<i32>} : memref<8x128xf32, #tpu.memory_space<vmem>>, vector<8x32xf32>,
    %72 = arith.truncf %69 : vector<8x32xf32> to vector<8x32xbf16>
    %c0_35 = arith.constant 0 : index
    %c0_36 = arith.constant 0 : index
    %73 = vector.load %arg5[%c0_35, %c0_36] : memref<32x16xbf16, #tpu.memory_space<vmem>>, vector<32x16xbf16>
    %cst_37 = arith.constant dense<0.000000e+00> : vector<8x16xf32>
    %74 = tpu.matmul %72, %73, %cst_37 {dimension_numbers = #tpu.dot_dimension_numbers<[1], [0], [0], [1], [0, 0, 1, 1], [], []>} : vector<8x32xbf16>, vector<32x16xbf16>, vector<8x16xf32> -> vector<8x16xf32>
    %c0_38 = arith.constant 0 : index
    %c0_39 = arith.constant 0 : index
    %75 = vector.load %arg6[%c0_38, %c0_39] : memref<1x16xf32, #tpu.memory_space<vmem>>, vector<1x16xf32>
    %76 = vector.broadcast %75 : vector<1x16xf32> to vector<8x16xf32>
    %77 = arith.addf %74, %76 : vector<8x16xf32>
    %78 = vector.extract_strided_slice %77 {offsets = [0, 0], sizes = [8, 8], strides = [1, 1]} : vector<8x16xf32> to vector<8x8xf32>
    %79 = vector.extract_strided_slice %77 {offsets = [0, 8], sizes = [8, 8], strides = [1, 1]} : vector<8x16xf32> to vector<8x8xf32>
    %c0_40 = arith.constant 0 : index
    %c0_41 = arith.constant 0 : index
    %80 = vector.load %arg8[%c0_40, %c0_41] : memref<8x8xf32, #tpu.memory_space<vmem>>, vector<8x8xf32>
    %cst_42 = arith.constant 5.000000e-01 : f32
    %81 = vector.broadcast %cst_42 : f32 to vector<8x8xf32>
    %82 = arith.mulf %81, %79 : vector<8x8xf32>
    %83 = math.exp %82 : vector<8x8xf32>
    %84 = arith.mulf %80, %83 : vector<8x8xf32>
    %85 = arith.addf %84, %78 : vector<8x8xf32>
    %c0_43 = arith.constant 0 : index
    %c0_44 = arith.constant 0 : index
    %86 = vector.load %arg9[%c0_43, %c0_44] : memref<8x24xf32, #tpu.memory_space<vmem>>, vector<8x8xf32>
    tpu.vector_store %arg9[%c0_43, %c0_44], %85 {strides = array<i32>} : memref<8x24xf32, #tpu.memory_space<vmem>>, vector<8x8xf32>,
    %c0_45 = arith.constant 0 : index
    %c8 = arith.constant 8 : index
    %87 = vector.load %arg9[%c0_45, %c8] : memref<8x24xf32, #tpu.memory_space<vmem>>, vector<8x16xf32>
    tpu.vector_store %arg9[%c0_45, %c8], %77 {strides = array<i32>} : memref<8x24xf32, #tpu.memory_space<vmem>>, vector<8x16xf32>,
    return
  }
}

</mosaic_0001>

<bundles_post_ra>
// kernel: gaussian_lstm_forward.1
= control target key start
LH: loop header
LB: loop body
LE: loop exit
PB: predicated region body
PF: predicated region fallthrough
CT: control target
= control target key end

     0   :  { %16 = vsyncpa [#allocation3], 0  ;;  %s696_s0 = inlined_call_operand.vmem [shape: f32[8,16], index: 0, kind: input, shape index: {}]   ;;  %s697_s1 = inlined_call_operand.vmem [shape: bf16[16,32], index: 1, kind: input, shape index: {}]   ;;  %s698_s2 = inlined_call_operand.vmem [shape: f32[1,32], index: 2, kind: input, shape index: {}]   ;;  %s699_s3 = inlined_call_operand.hbm [shape: bf16[2,64,128], index: 3, kind: input, shape index: {}]   ;;  %s700_s4 = inlined_call_operand.vmem [shape: f32[2,1,128], index: 4, kind: input, shape index: {}]   ;;  %s701_s5 = inlined_call_operand.vmem [shape: bf16[32,16], index: 5, kind: input, shape index: {}]   ;;  %s702_s6 = inlined_call_operand.hbm [shape: f32[1,16], index: 6, kind: input, shape index: {}]   ;;  %s703_s7 = inlined_call_operand.vmem [shape: f32[8,128], index: 7, kind: input, shape index: {}, may-alias: {7,10}]   ;;  %s704_s8 = inlined_call_operand.vmem [shape: f32[8,8], index: 8, kind: input, shape index: {}]   ;;  %s705_s9 = inlined_call_operand.vmem [shape: f32[8,24], index: 9, kind: output, shape index: {0}]   ;;  %s706_s10 = inlined_call_operand.vmem [shape: f32[8,128], index: 10, kind: output, shape index: {1}, may-alias: {7,10}]  }
   0x1   :  { %s28_s15 = sshll.u32 %s699_s3, 4  ;;  %s29_s15 = int_to_ptr.hbm [resolvable:$true] %s28_s15 }
   0x2   :  { %17 = vsyncpa [#allocation5], 0  ;;  %s558_s16 = smov [#allocation2]   ;;  %s46_s20 = sshll.u32 %s702_s6, 4  ;;  %s47_s20 = int_to_ptr.hbm [resolvable:$true] %s46_s20 }
   0x3   :  { %s30_s17 = sshll.u32 %s558_s16, 4  ;;  %s559_s21 = smov 64   ;;  %s31_s17 = int_to_ptr.vmem [resolvable:$true] %s30_s17 }
   0x4   :  { %s560_s22 = smov 4   ;;  %s561_s23 = smov [#allocation4]  }
   0x5   :  { %36 = dma.hbm_to_vmem [thread:$0]  %s29_s15, 1024, %s31_s17, [#allocation3], %s559_s21, %s559_s21, %s560_s22  }
   0x6   :  { %s48_s24 = sshll.u32 %s561_s23, 4  ;;  %s49_s24 = int_to_ptr.vmem [resolvable:$true] %s48_s24 }
   0x7   :  { %51 = dma.hbm_to_vmem [thread:$0]  %s47_s20, 16, %s49_s24, [#allocation5]  }
   0x8   :  { %554 = dma.done.wait [#allocation3], 1024  }
   0x9   :  { %555 = vsyncadd [#allocation3], 4294966272 }
   0xa   :  { %556 = dma.done.wait [#allocation5], 16  }
   0xb   :  { %557 = vsyncadd [#allocation5], 4294967280  ;;  %v465_v0 = vld [vmem:[%s697_s1] sm:$0xff]  ;;  %v469_v2 = vld [vmem:[#allocation2 + $0x18] sm:$0xff]  ;;  %vm80_vm0 = vcmask 130048   ;;  %vm119_vm1 = vcmask 261120  }
   0xc   :  { %v66_v1 = vld [vmem:[%s696_s0] sm:$0xff]  ;;  %v467_v4 = vld [vmem:[#allocation2 + $0x8] sm:$0xff]  ;;  %91 = vmatpush.bf16.msra.mxu0 %v465_v0  ;;  %129 = vmatpush.bf16.msra.mxu1 %v469_v2  ;;  %v468_v5 = vld [vmem:[#allocation2 + $0x10] sm:$0xff]  ;;  %vm211_vm10 = vcmask 523520   ;;  %s563_s19 = smov 96   ;;  %vm336_vm11 = vcmask 785920  }
   0xd   :  { %v67_v3 = vpack.c.bf16 %v66_v1, %v66_v1  ;;  %157 = vmatpush.bf16.msra.mxu2 %v467_v4  ;;  %v466_v6 = vld [vmem:[#allocation2] sm:$0xff]  ;;  %v473_v41 = vld [vmem:[#allocation2 + $0x38] sm:$0xff]  ;;  %v471_v42 = vld [vmem:[#allocation2 + $0x28] sm:$0xff]  ;;  %s564_s22 = smov 8   ;;  %s565_s23 = smov 120   ;;  %vm394_vm12 = vcmask 64512  }
   0xe   :  { %v65_v7 = vld [vmem:[%s703_s7] sm:$0xff]  ;;  %247 = vmatpush.bf16.msra.mxu3 %v473_v41  ;;  %v472_v43 = vld [vmem:[#allocation2 + $0x30] sm:$0xff]  ;;  %vm400_vm13 = vcmask 195648   ;;  %vm342_vm14 = vcmask 1048320  }
   0xf   :  { %416 = vmatmul.msk.bf16.vlgmr.msra.gmra.mxu0 %vm80_vm0, %v67_v3  ;;  %v102_v8 = vpack.c.bf16 %v65_v7, %v65_v7  ;;  %v484_v9 = vld [vmem:[%s698_s2] ss:$0 sm:$0xff]  ;;  %s562_s2 = smov 32   ;;  %v486_v52 = vld [vmem:[%s700_s4 + $0x1] ss:$0 sm:$0xff] }
  0x10   :  { %130 = vmatpush.bf16.msra.mxu1 %v468_v5  ;;  %v485_v16 = vld [vmem:[%s700_s4] ss:$0 sm:$0xff]  ;;  %278 = vmatpush.bf16.msrb.mxu0 %v471_v42 }
  0x11   :  { %158 = vmatpush.bf16.msra.mxu2 %v466_v6  ;;  %v470_v44 = vld [vmem:[#allocation2 + $0x20] sm:$0xff] }
  0x12   :  { %248 = vmatpush.bf16.msra.mxu3 %v472_v43 }
  0x13   :  { %425 = vmatmul.msk.bf16.vlgmr.msra.gmra.mxu1 %vm119_vm1, %v102_v8 }
  0x14   :  { %279 = vmatpush.bf16.msrb.mxu0 %v470_v44 }
  0x8c   :  { %v93_v10 = vpop.f32.mrf.mxu0 }
  0x8d   :  { %v94_v11 = vadd.f32 %v484_v9, %v93_v10 }
  0x8f   :  { %v97_v12 = vpack.c.bf16 %v94_v11, %v94_v11 }
  0x90   :  { %v132_v14 = vpop.f32.mrf.mxu1 }
  0x91   :  { %434 = vmatmul.msk.bf16.vlgmr.msra.gmra.mxu2 %vm119_vm1, %v97_v12 }
  0x94   :  { %v95_v13 = vpop.f32.mrf.mxu0 }
  0x98   :  { %v134_v15 = vpop.f32.mrf.mxu1 }
  0x99   :  { %v474_v15 = vld [vmem:[%s701_s5] sm:$0xff] }
 0x114   :  { %v160_v17 = vpop.f32.mrf.mxu2 }
 0x115   :  { %v161_v18 = vadd.f32 %v160_v17, %v132_v14  ;;  %v475_v14 = vld [vmem:[%s701_s5 + $0x8] sm:$0xff] }
 0x116   :  { %377 = vmatpush.bf16.msrb.mxu1 %v475_v14 }
 0x117   :  { %v168_v19 = vadd.f32 %v485_v16, %v161_v18 }
 0x119   :  { %488 = vtanh.f32 %v168_v19  ;;  %v435_v22 = vmul.f32 -1.442695, %v168_v19 }
 0x11a   :  { %378 = vmatpush.bf16.msrb.mxu1 %v474_v15 }
 0x11b   :  { %490 = vpow2.f32 %v435_v22  ;;  %v487_v22 = vld [vmem:[#allocation4] ss:$0 sm:$0xff] }
 0x11c   :  { %v162_v20 = vpop.f32.mrf.mxu2 }
 0x11f   :  { %v489_v21 = vpop.eup %488 }
 0x120   :  { %191 = vrot.lane.b32.xlu0 %v489_v21, %s559_s21 }
 0x121   :  { %v491_v23 = vpop.eup %490 }
 0x122   :  { %v172_v24 = vadd.f32 1.0, %v491_v23 }
 0x124   :  { %492 = vrcp.f32 %v172_v24  ;;  %v184_v30 = vand.u32 2147483648, %v172_v24  ;;  %vm178_vm3 = vweird.f32 %v172_v24  ;;  %v182_v31 = vand.u32 2147483647, %v172_v24 }
 0x126   :  { %v185_v33 = vor.u32 1.1754944e-38, %v184_v30  ;;  %vm183_vm5 = vcmp.eq.f32.partialorder %v182_v31, 8.507059e+37 }
 0x12a   :  { %v493_v25 = vpop.eup %492 }
 0x12b   :  { %v174_v26 = vmul.f32 %v493_v25, %v172_v24  ;;  %vm179_vm2 = vweird.f32 %v493_v25 }
 0x12c   :  { %vm180_vm4 = vmor %vm178_vm3, %vm179_vm2 }
 0x12d   :  { %v175_v27 = vsub.f32 1.0, %v174_v26 }
 0x12f   :  { %v176_v28 = vmul.f32 %v493_v25, %v175_v27 }
 0x131   :  { %v177_v29 = vadd.f32 %v493_v25, %v176_v28 }
 0x133   :  { %v181_v32 = vsel %vm180_vm4, %v493_v25, %v177_v29  ;;  %v384_v29 = vld [vmem:[%s704_s8] sm:$0xff] }
 0x134   :  { %v186_v35 = vsel %vm183_vm5, %v185_v33, %v181_v32 }
 0x135   :  { %v189_v37 = vmul.f32 %v186_v35, %v65_v7 }
 0x192   :  { %v192_v34 = vpop.permute.xlu0 %191 }
 0x193   :  { %v194_v36 = vmul.f32 %v192_v34, %v186_v35 }
 0x195   :  { %196 = vrot.lane.b32.xlu0 %v194_v36, %s562_s2 }
 0x19d   :  { %312 = vrot.lane.b32.xlu0 %v65_v7, %s559_s21 }
 0x207   :  { %v197_v38 = vpop.permute.xlu0 %196 }
 0x208   :  { %v649_v39 = vadd.f32 %v197_v38, %v189_v37 }
 0x20a   :  { %494 = vtanh.f32 %v649_v39 }
 0x20f   :  { %v313_v9 = vpop.permute.xlu0 %312 }
 0x210   :  { %v495_v40 = vpop.eup %494 }
 0x211   :  { %202 = vrot.lane.b32.xlu1 %v495_v40, %s559_s21 }
 0x219   :  { %224 = vrot.lane.b32.xlu1 %v102_v8, %s559_s21 }
 0x283   :  { %v203_v45 = vpop.permute.xlu1 %202 }
 0x284   :  { %v205_v46 = vmul.f32 %v203_v45, %v186_v35 }
 0x286   :  { %v213_v47 = vpack.c.bf16 %v205_v46, %v205_v46 }
 0x288   :  { %255 = vrot.lane.b32.xlu2 %v213_v47, %s562_s2 }
 0x28b   :  { %v225_v48 = vpop.permute.xlu1 %224 }
 0x28c   :  { %444 = vmatmul.msk.bf16.vlgmr.msra.gmra.mxu3 %vm119_vm1, %v225_v48 }
 0x2e2   :  { %v256_v49 = vpop.permute.xlu2 %255 }
 0x2e3   :  { %453 = vmatmul.msk.bf16.vlgmr.msrb.gmra.mxu0 %vm119_vm1, %v256_v49 }
 0x30f   :  { %v250_v50 = vpop.f32.mrf.mxu3 }
 0x317   :  { %v252_v51 = vpop.f32.mrf.mxu3 }
 0x360   :  { %v281_v53 = vpop.f32.mrf.mxu0 }
 0x361   :  { %v282_v54 = vadd.f32 %v281_v53, %v250_v50 }
 0x363   :  { %v290_v55 = vadd.f32 %v486_v52, %v282_v54 }
 0x365   :  { %496 = vtanh.f32 %v290_v55  ;;  %v455_v58 = vmul.f32 -1.442695, %v290_v55 }
 0x367   :  { %498 = vpow2.f32 %v455_v58 }
 0x368   :  { %v283_v56 = vpop.f32.mrf.mxu0 }
 0x36b   :  { %v497_v57 = vpop.eup %496 }
 0x36c   :  { %317 = vrot.lane.b32.xlu2 %v497_v57, %s559_s21 }
 0x36d   :  { %v499_v59 = vpop.eup %498 }
 0x36e   :  { %v294_v60 = vadd.f32 1.0, %v499_v59 }
 0x370   :  { %500 = vrcp.f32 %v294_v60  ;;  %v306_v2 = vand.u32 2147483648, %v294_v60  ;;  %vm300_vm7 = vweird.f32 %v294_v60  ;;  %v304_v3 = vand.u32 2147483647, %v294_v60 }
 0x372   :  { %v307_v5 = vor.u32 1.1754944e-38, %v306_v2  ;;  %vm305_vm9 = vcmp.eq.f32.partialorder %v304_v3, 8.507059e+37 }
 0x376   :  { %v501_v61 = vpop.eup %500 }
 0x377   :  { %v296_v62 = vmul.f32 %v501_v61, %v294_v60  ;;  %vm301_vm6 = vweird.f32 %v501_v61 }
 0x378   :  { %vm302_vm8 = vmor %vm300_vm7, %vm301_vm6 }
 0x379   :  { %v297_v63 = vsub.f32 1.0, %v296_v62 }
 0x37b   :  { %v298_v0 = vmul.f32 %v501_v61, %v297_v63 }
 0x37d   :  { %v299_v1 = vadd.f32 %v501_v61, %v298_v0 }
 0x37f   :  { %v303_v4 = vsel %vm302_vm8, %v501_v61, %v299_v1 }
 0x380   :  { %v308_v6 = vsel %vm305_vm9, %v307_v5, %v303_v4 }
 0x381   :  { %v315_v10 = vmul.f32 %v313_v9, %v308_v6 }
 0x3c6   :  { %v318_v7 = vpop.permute.xlu2 %317 }
 0x3c7   :  { %v320_v8 = vmul.f32 %v318_v7, %v308_v6 }
 0x3c9   :  { %322 = vrot.lane.b32.xlu1 %v320_v8, %s562_s2 }
 0x43b   :  { %v323_v11 = vpop.permute.xlu1 %322 }
 0x43c   :  { %v325_v12 = vadd.f32 %v323_v11, %v315_v10 }
 0x43e   :  { %502 = vtanh.f32 %v325_v12 }
 0x444   :  { %v503_v13 = vpop.eup %502 }
 0x445   :  { %328 = vrot.lane.b32.xlu2 %v503_v13, %s559_s21 }
 0x44d   :  { %207 = vrot.lane.b32.xlu2 %v205_v46, %s562_s2 }
 0x49f   :  { %v329_v16 = vpop.permute.xlu2 %328 }
 0x4a0   :  { %v331_v17 = vmul.f32 %v329_v16, %v308_v6 }
 0x4a2   :  { %v344_v18 = vpack.c.bf16 %v331_v17, %v331_v17 }
 0x4a4   :  { %354 = vrot.lane.b32.xlu0 %v344_v18, %s562_s2 }
 0x4a7   :  { %v208_v19 = vpop.permute.xlu2 %207 }
 0x4a8   :  { %210 = vst.msk [vmem:[%s706_s10] sm:$0xff] %vm119_vm1, %v208_v19 }
 0x4a9   :  { %212 = vst.msk [vmem:[%s706_s10] sm:$0xff] %vm211_vm10, %v649_v39 }
 0x4ac   :  { %333 = vrot.lane.b32.xlu0 %v331_v17, %s563_s19 }
 0x516   :  { %v355_v20 = vpop.permute.xlu0 %354 }
 0x517   :  { %464 = vmatmul.msk.bf16.vlgmr.msrb.gmra.mxu1 %vm119_vm1, %v355_v20 }
 0x51e   :  { %v334_v21 = vpop.permute.xlu0 %333 }
 0x51f   :  { %337 = vst.msk [vmem:[%s706_s10] sm:$0xff] %vm336_vm11, %v334_v21 }
 0x594   :  { %v380_v23 = vpop.f32.mrf.mxu1 }
 0x595   :  { %v381_v24 = vadd.f32 %v487_v22, %v380_v23 }
 0x597   :  { %v385_v25 = vmul.f32 0.5, %v381_v24  ;;  %397 = vrot.lane.b32.xlu2 %v381_v24, %s564_s22 }
 0x599   :  { %v386_v26 = vmul.f32 1.442695, %v385_v25 }
 0x59b   :  { %504 = vpow2.f32 %v386_v26 }
 0x59c   :  { %v382_v27 = vpop.f32.mrf.mxu1 }
 0x5a1   :  { %v505_v28 = vpop.eup %504 }
 0x5a2   :  { %389 = vrot.lane.b32.xlu1 %v505_v28, %s565_s23 }
 0x5aa   :  { %339 = vrot.lane.b32.xlu1 %v325_v12, %s559_s21 }
 0x5f1   :  { %v398_v33 = vpop.permute.xlu2 %397 }
 0x614   :  { %v390_v30 = vpop.permute.xlu1 %389 }
 0x615   :  { %v392_v31 = vmul.f32 %v390_v30, %v384_v29 }
 0x617   :  { %v393_v32 = vadd.f32 %v392_v31, %v381_v24 }
 0x619   :  { %395 = vst.msk [vmem:[%s705_s9] sm:$0xff] %vm394_vm12, %v393_v32 }
 0x61a   :  { %401 = vst.msk [vmem:[%s705_s9] sm:$0xff] %vm400_vm13, %v398_v33 }
 0x61c   :  { %v340_v34 = vpop.permute.xlu1 %339 }
 0x61d   :  { %343 = vst.msk [vmem:[%s706_s10] sm:$0xff] %vm342_vm14, %v340_v34 }
 0x61e   :  { %410 = vsyncpa [#allocation3], 1 }
 0x61f   :  { %411 = vsyncpa [#allocation5], 1 }

</bundles_post_ra>
